<compile_context>
chip_gen: v5e
topology: v5e:2x2
jax: 0.10.0
libtpu: 0.0.40
codegen_flags: <defaults>
</compile_context>

<pallas_src>
import functools

import numpy as np
import jax
import jax.numpy as jnp
from jax.experimental import pallas as pl
from jax.experimental.pallas import tpu as pltpu

WIN_SIZE = 16
DIM_AUD = 64
C_IN = 29

# Per-layer output widths on the flattened (time*channel) axis:
#   conv1: 8*32, conv2: 4*32, conv3: 2*64, conv4: 1*64, fc1: 64, fc2: 64
LAYER_OUT = (256, 128, 128, 64, 64, 64)
CONV_T_IN = (16, 8, 4, 2)
BIAS_PAD = 256  # widest bias row


def _round_up(n, m):
    return ((n + m - 1) // m) * m


# -----------------------------------------------------------------------------
# Pallas kernel: full AudioNet forward for one batch tile (6 matmuls).
# -----------------------------------------------------------------------------
def audionet_kernel(x_ref, w1, w2, w3, w4, w5, w6, b_ref, out_ref):
    act_dtype = x_ref.dtype  # MXU operand dtype (f32 or bf16)

    def layer(h, w_ref, idx, relu):
        n = LAYER_OUT[idx]
        y = jnp.dot(h, w_ref[...], preferred_element_type=jnp.float32)
        y = y + b_ref[idx:idx + 1, :n]            # f32 bias add (VPU)
        if relu:
            # LeakyReLU(0.02); slope < 1 so max(v, 0.02*v) is exact, in f32.
            y = jnp.maximum(y, 0.02 * y)
        return y

    h = x_ref[...]                                # [tb, 16*29 = 464]
    for idx, w_ref in enumerate((w1, w2, w3, w4, w5)):
        h = layer(h, w_ref, idx, relu=True).astype(act_dtype)
    out = layer(h, w6, 5, relu=False)             # [tb, 64]
    out_ref[...] = out.astype(out_ref.dtype)


# -----------------------------------------------------------------------------
# Wrapper: batch tiling via BlockSpecs; weights/biases passed as whole blocks.
# -----------------------------------------------------------------------------
@functools.partial(jax.jit, static_argnames=("tb", "compute_dtype"))
def audionet_pallas(x, kparams, tb=256, compute_dtype=jnp.bfloat16):
    # x: [B, win_size, 29] (PyTorch forward convention)
    B, T, C = x.shape
    assert T == WIN_SIZE and C == C_IN
    w_list, b_all = kparams[:-1], kparams[-1]

    # Effective batch tile: large (default 256), multiple of 16 (bf16 sublane
    # packing), no bigger than the padded batch.
    tb_eff = max(16, min(_round_up(tb, 16), _round_up(B, 16)))
    Bp = _round_up(B, tb_eff)

    # Free row-major reshape (no transpose / HBM round trip).
    xc = x.reshape(B, T * C).astype(compute_dtype)
    if Bp != B:
        xc = jnp.pad(xc, ((0, Bp - B), (0, 0)))

    weights = [w.astype(compute_dtype) for w in w_list]
    b_all = b_all.astype(jnp.float32)      # bias + activations stay f32

    in_specs = [pl.BlockSpec((tb_eff, T * C), lambda i: (i, 0))]
    for w in weights:
        in_specs.append(pl.BlockSpec(w.shape, lambda i: (0, 0)))
    in_specs.append(pl.BlockSpec(b_all.shape, lambda i: (0, 0)))

    flops = 2 * Bp * sum(int(w.size) for w in weights)
    bytes_accessed = (int(xc.size) * xc.dtype.itemsize
                      + sum(int(w.size) * w.dtype.itemsize for w in weights)
                      + int(b_all.size) * 4 + Bp * DIM_AUD * 4)

    out = pl.pallas_call(
        audionet_kernel,
        out_shape=jax.ShapeDtypeStruct((Bp, DIM_AUD), jnp.float32),
        grid_spec=pltpu.PrefetchScalarGridSpec(
            num_scalar_prefetch=0,
            grid=(Bp // tb_eff,),
            in_specs=in_specs,
            out_specs=pl.BlockSpec((tb_eff, DIM_AUD), lambda i: (i, 0)),
        ),
        compiler_params=pltpu.CompilerParams(
            dimension_semantics=("parallel",)),
        cost_estimate=pl.CostEstimate(flops=flops, transcendentals=0,
                                      bytes_accessed=bytes_accessed),
    )(xc, *weights, b_all)

    return out[:B]


# -----------------------------------------------------------------------------
# Deterministic parameter init (PyTorch layouts) + weight pre-packing.
# -----------------------------------------------------------------------------
def init_params():
    keys = jax.random.split(jax.random.PRNGKey(0), 12)
    ki = 0
    conv_defs = [(C_IN, 32), (32, 32), (32, 64), (64, 64)]
    conv_params = []
    for cin, cout in conv_defs:
        w = 0.1 * jax.random.normal(keys[ki], (cout, cin, 3), jnp.float32)
        ki += 1
        b = 0.1 * jax.random.normal(keys[ki], (cout,), jnp.float32)
        ki += 1
        conv_params.append((w, b))
    fc_defs = [(64, 64), (64, DIM_AUD)]
    fc_params = []
    for din, dout in fc_defs:
        w = 0.1 * jax.random.normal(keys[ki], (dout, din), jnp.float32)
        ki += 1
        b = 0.1 * jax.random.normal(keys[ki], (dout,), jnp.float32)
        ki += 1
        fc_params.append((w, b))
    return conv_params, fc_params


def to_kernel_params(conv_params, fc_params):
    """Build block-banded conv matrices over the flattened (time*chan) axis.

    Flattened index convention: idx = t * C + c (time-major, channel fastest),
    which is exactly x.reshape(B, T*C) of the PyTorch [B, T, C] input.
    Conv1d(k=3, s=2, p=1): out time t' uses in times 2t'-1, 2t', 2t'+1 with
    weight taps k = 0, 1, 2 (out-of-range time = zero pad -> block omitted).
    """
    ws = []
    for (w, _), t_in in zip(conv_params, CONV_T_IN):
        w = np.asarray(w)                       # [cout, cin, 3] (PyTorch)
        cout, cin, _ = w.shape
        t_out = t_in // 2
        W = np.zeros((t_in * cin, t_out * cout), np.float32)
        for tp in range(t_out):
            for k in range(3):
                ti = 2 * tp + k - 1
                if 0 <= ti < t_in:
                    W[ti * cin:(ti + 1) * cin,
                      tp * cout:(tp + 1) * cout] = w[:, :, k].T
        ws.append(jnp.asarray(W))
    for w, _ in fc_params:                      # Linear: y = x @ W^T + b
        ws.append(jnp.asarray(np.asarray(w).T))

    # Biases: conv biases tiled over surviving output times; all rows padded
    # to the widest (256) and stacked into one [6, 256] f32 array.
    rows = []
    for (_, b), t_in in zip(conv_params, CONV_T_IN):
        row = np.tile(np.asarray(b), t_in // 2)
        rows.append(np.pad(row, (0, BIAS_PAD - row.shape[0])))
    for _, b in fc_params:
        b = np.asarray(b)
        rows.append(np.pad(b, (0, BIAS_PAD - b.shape[0])))
    b_all = jnp.asarray(np.stack(rows, axis=0).astype(np.float32))
    return ws + [b_all]


# -----------------------------------------------------------------------------
# Pure-JAX reference implementing the PyTorch ops directly (true f32).
# -----------------------------------------------------------------------------
def ref_forward(x, conv_params, fc_params):
    hp_prec = jax.lax.Precision.HIGHEST

    def leaky(v):
        return jnp.where(v > 0, v, 0.02 * v)

    h = jnp.transpose(x, (0, 2, 1))  # [B, 29, 16] (NCL)
    for w, b in conv_params:
        _, _, L = h.shape
        hp = jnp.pad(h, ((0, 0), (0, 0), (1, 1)))
        cols = []
        for t in range(L // 2):
            # out[b,o,t] = sum_{c,k} w[o,c,k] * x_pad[b,c,2t+k]
            cols.append(jnp.einsum('bck,ock->bo', hp[:, :, 2 * t:2 * t + 3],
                                   w, precision=hp_prec))
        h = jnp.stack(cols, axis=-1) + b[None, :, None]
        h = leaky(h)
    h = h[:, :, 0]  # squeeze(-1)
    (w1, b1), (w2, b2) = fc_params
    h = leaky(jnp.dot(h, w1.T, precision=hp_prec) + b1)
    h = jnp.dot(h, w2.T, precision=hp_prec) + b2
    return h


if __name__ == "__main__":
    B = 64
    x = jax.random.normal(jax.random.PRNGKey(0), (B, WIN_SIZE, C_IN),
                          jnp.float32)

    conv_params, fc_params = init_params()
    kparams = to_kernel_params(conv_params, fc_params)
    ref = ref_forward(x, conv_params, fc_params)

    # f32 MXU operands; 2 grid steps (exercises megacore sharding on v7x).
    out_f32 = jax.block_until_ready(
        audionet_pallas(x, kparams, tb=32, compute_dtype=jnp.float32))
    assert out_f32.shape == (B, DIM_AUD)
    assert jnp.allclose(out_f32, ref, atol=5e-2, rtol=5e-2), (
        float(jnp.max(jnp.abs(out_f32 - ref))))

    # bf16 MXU operands (v6e/v7x fast path); f32 accumulate + elementwise.
    out_bf16 = jax.block_until_ready(
        audionet_pallas(x, kparams, tb=32, compute_dtype=jnp.bfloat16))
    assert jnp.allclose(out_bf16, ref, atol=1e-1, rtol=1e-1), (
        float(jnp.max(jnp.abs(out_bf16 - ref))))

    # Non-multiple batch exercises the wrapper-side padding path.
    out_pad = jax.block_until_ready(
        audionet_pallas(x[:50], kparams, tb=32, compute_dtype=jnp.float32))
    assert out_pad.shape == (50, DIM_AUD)
    assert jnp.allclose(out_pad, ref[:50], atol=5e-2, rtol=5e-2)

    print("KERNEL_OK")
</pallas_src>

<mosaic_0001>
module attributes {stable_mosaic.version = 11 : i64} {
  func.func @audionet_kernel(%arg0: i32, %arg1: memref<32x464xf32, #tpu.memory_space<vmem>>, %arg2: memref<464x256xf32, #tpu.memory_space<vmem>>, %arg3: memref<256x128xf32, #tpu.memory_space<vmem>>, %arg4: memref<128x128xf32, #tpu.memory_space<vmem>>, %arg5: memref<128x64xf32, #tpu.memory_space<vmem>>, %arg6: memref<64x64xf32, #tpu.memory_space<vmem>>, %arg7: memref<64x64xf32, #tpu.memory_space<vmem>>, %arg8: memref<6x256xf32, #tpu.memory_space<vmem>>, %arg9: memref<32x64xf32, #tpu.memory_space<vmem>>) attributes {dimension_semantics = [#tpu.dimension_semantics<parallel>], iteration_bounds = array<i64: 2>, scalar_prefetch = 0 : i64, scratch_operands = 0 : i64, tpu.core_type = #tpu.core_type<tc>, window_params = [{transform_indices = @transform_0, window_bounds = array<i64: 32, 464>}, {pipeline_mode = #tpu.pipeline_mode<synchronous>, transform_indices = @transform_1, window_bounds = array<i64: 464, 256>}, {pipeline_mode = #tpu.pipeline_mode<synchronous>, transform_indices = @transform_2, window_bounds = array<i64: 256, 128>}, {pipeline_mode = #tpu.pipeline_mode<synchronous>, transform_indices = @transform_3, window_bounds = array<i64: 128, 128>}, {pipeline_mode = #tpu.pipeline_mode<synchronous>, transform_indices = @transform_4, window_bounds = array<i64: 128, 64>}, {pipeline_mode = #tpu.pipeline_mode<synchronous>, transform_indices = @transform_5, window_bounds = array<i64: 64, 64>}, {pipeline_mode = #tpu.pipeline_mode<synchronous>, transform_indices = @transform_6, window_bounds = array<i64: 64, 64>}, {pipeline_mode = #tpu.pipeline_mode<synchronous>, transform_indices = @transform_7, window_bounds = array<i64: 6, 256>}, {transform_indices = @transform_8, window_bounds = array<i64: 32, 64>}]} {
    %c0 = arith.constant 0 : index
    %c0_0 = arith.constant 0 : index
    %0 = vector.load %arg1[%c0, %c0_0] : memref<32x464xf32, #tpu.memory_space<vmem>>, vector<32x464xf32>
    %c0_1 = arith.constant 0 : index
    %c0_2 = arith.constant 0 : index
    %1 = vector.load %arg2[%c0_1, %c0_2] : memref<464x256xf32, #tpu.memory_space<vmem>>, vector<464x256xf32>
    %cst = arith.constant dense<0.000000e+00> : vector<32x256xf32>
    %2 = tpu.matmul %0, %1, %cst {dimension_numbers = #tpu.dot_dimension_numbers<[1], [0], [0], [1], [0, 0, 1, 1], [], []>} : vector<32x464xf32>, vector<464x256xf32>, vector<32x256xf32> -> vector<32x256xf32>
    %c0_3 = arith.constant 0 : index
    %c0_4 = arith.constant 0 : index
    %3 = vector.load %arg8[%c0_3, %c0_4] : memref<6x256xf32, #tpu.memory_space<vmem>>, vector<1x256xf32>
    %4 = vector.broadcast %3 : vector<1x256xf32> to vector<32x256xf32>
    %5 = arith.addf %2, %4 : vector<32x256xf32>
    %cst_5 = arith.constant 2.000000e-02 : f32
    %6 = vector.broadcast %cst_5 : f32 to vector<32x256xf32>
    %7 = arith.mulf %6, %5 : vector<32x256xf32>
    %8 = arith.maximumf %5, %7 : vector<32x256xf32>
    %c0_6 = arith.constant 0 : index
    %c0_7 = arith.constant 0 : index
    %9 = vector.load %arg3[%c0_6, %c0_7] : memref<256x128xf32, #tpu.memory_space<vmem>>, vector<256x128xf32>
    %cst_8 = arith.constant dense<0.000000e+00> : vector<32x128xf32>
    %10 = tpu.matmul %8, %9, %cst_8 {dimension_numbers = #tpu.dot_dimension_numbers<[1], [0], [0], [1], [0, 0, 1, 1], [], []>} : vector<32x256xf32>, vector<256x128xf32>, vector<32x128xf32> -> vector<32x128xf32>
    %c1 = arith.constant 1 : index
    %c0_9 = arith.constant 0 : index
    %11 = vector.load %arg8[%c1, %c0_9] : memref<6x256xf32, #tpu.memory_space<vmem>>, vector<1x128xf32>
    %12 = vector.broadcast %11 : vector<1x128xf32> to vector<32x128xf32>
    %13 = arith.addf %10, %12 : vector<32x128xf32>
    %cst_10 = arith.constant 2.000000e-02 : f32
    %14 = vector.broadcast %cst_10 : f32 to vector<32x128xf32>
    %15 = arith.mulf %14, %13 : vector<32x128xf32>
    %16 = arith.maximumf %13, %15 : vector<32x128xf32>
    %c0_11 = arith.constant 0 : index
    %c0_12 = arith.constant 0 : index
    %17 = vector.load %arg4[%c0_11, %c0_12] : memref<128x128xf32, #tpu.memory_space<vmem>>, vector<128x128xf32>
    %cst_13 = arith.constant dense<0.000000e+00> : vector<32x128xf32>
    %18 = tpu.matmul %16, %17, %cst_13 {dimension_numbers = #tpu.dot_dimension_numbers<[1], [0], [0], [1], [0, 0, 1, 1], [], []>} : vector<32x128xf32>, vector<128x128xf32>, vector<32x128xf32> -> vector<32x128xf32>
    %c2 = arith.constant 2 : index
    %c0_14 = arith.constant 0 : index
    %19 = vector.load %arg8[%c2, %c0_14] : memref<6x256xf32, #tpu.memory_space<vmem>>, vector<1x128xf32>
    %20 = vector.broadcast %19 : vector<1x128xf32> to vector<32x128xf32>
    %21 = arith.addf %18, %20 : vector<32x128xf32>
    %cst_15 = arith.constant 2.000000e-02 : f32
    %22 = vector.broadcast %cst_15 : f32 to vector<32x128xf32>
    %23 = arith.mulf %22, %21 : vector<32x128xf32>
    %24 = arith.maximumf %21, %23 : vector<32x128xf32>
    %c0_16 = arith.constant 0 : index
    %c0_17 = arith.constant 0 : index
    %25 = vector.load %arg5[%c0_16, %c0_17] : memref<128x64xf32, #tpu.memory_space<vmem>>, vector<128x64xf32>
    %cst_18 = arith.constant dense<0.000000e+00> : vector<32x64xf32>
    %26 = tpu.matmul %24, %25, %cst_18 {dimension_numbers = #tpu.dot_dimension_numbers<[1], [0], [0], [1], [0, 0, 1, 1], [], []>} : vector<32x128xf32>, vector<128x64xf32>, vector<32x64xf32> -> vector<32x64xf32>
    %c3 = arith.constant 3 : index
    %c0_19 = arith.constant 0 : index
    %27 = vector.load %arg8[%c3, %c0_19] : memref<6x256xf32, #tpu.memory_space<vmem>>, vector<1x64xf32>
    %28 = vector.broadcast %27 : vector<1x64xf32> to vector<32x64xf32>
    %29 = arith.addf %26, %28 : vector<32x64xf32>
    %cst_20 = arith.constant 2.000000e-02 : f32
    %30 = vector.broadcast %cst_20 : f32 to vector<32x64xf32>
    %31 = arith.mulf %30, %29 : vector<32x64xf32>
    %32 = arith.maximumf %29, %31 : vector<32x64xf32>
    %c0_21 = arith.constant 0 : index
    %c0_22 = arith.constant 0 : index
    %33 = vector.load %arg6[%c0_21, %c0_22] : memref<64x64xf32, #tpu.memory_space<vmem>>, vector<64x64xf32>
    %cst_23 = arith.constant dense<0.000000e+00> : vector<32x64xf32>
    %34 = tpu.matmul %32, %33, %cst_23 {dimension_numbers = #tpu.dot_dimension_numbers<[1], [0], [0], [1], [0, 0, 1, 1], [], []>} : vector<32x64xf32>, vector<64x64xf32>, vector<32x64xf32> -> vector<32x64xf32>
    %c4 = arith.constant 4 : index
    %c0_24 = arith.constant 0 : index
    %35 = vector.load %arg8[%c4, %c0_24] : memref<6x256xf32, #tpu.memory_space<vmem>>, vector<1x64xf32>
    %36 = vector.broadcast %35 : vector<1x64xf32> to vector<32x64xf32>
    %37 = arith.addf %34, %36 : vector<32x64xf32>
    %cst_25 = arith.constant 2.000000e-02 : f32
    %38 = vector.broadcast %cst_25 : f32 to vector<32x64xf32>
    %39 = arith.mulf %38, %37 : vector<32x64xf32>
    %40 = arith.maximumf %37, %39 : vector<32x64xf32>
    %c0_26 = arith.constant 0 : index
    %c0_27 = arith.constant 0 : index
    %41 = vector.load %arg7[%c0_26, %c0_27] : memref<64x64xf32, #tpu.memory_space<vmem>>, vector<64x64xf32>
    %cst_28 = arith.constant dense<0.000000e+00> : vector<32x64xf32>
    %42 = tpu.matmul %40, %41, %cst_28 {dimension_numbers = #tpu.dot_dimension_numbers<[1], [0], [0], [1], [0, 0, 1, 1], [], []>} : vector<32x64xf32>, vector<64x64xf32>, vector<32x64xf32> -> vector<32x64xf32>
    %c5 = arith.constant 5 : index
    %c0_29 = arith.constant 0 : index
    %43 = vector.load %arg8[%c5, %c0_29] : memref<6x256xf32, #tpu.memory_space<vmem>>, vector<1x64xf32>
    %44 = vector.broadcast %43 : vector<1x64xf32> to vector<32x64xf32>
    %45 = arith.addf %42, %44 : vector<32x64xf32>
    %c0_30 = arith.constant 0 : index
    %c0_31 = arith.constant 0 : index
    %46 = vector.load %arg9[%c0_30, %c0_31] : memref<32x64xf32, #tpu.memory_space<vmem>>, vector<32x64xf32>
    tpu.vector_store %arg9[%c0_30, %c0_31], %45 {strides = array<i32>} : memref<32x64xf32, #tpu.memory_space<vmem>>, vector<32x64xf32>,
    return
  }
  func.func @transform_0(%arg0: i32) -> (i32, i32) {
    %c0_i32 = arith.constant 0 : i32
    %c0_i32_0 = arith.constant 0 : i32
    return %arg0, %c0_i32 : i32, i32
  }
  func.func @transform_1(%arg0: i32) -> (i32, i32) {
    %c0_i32 = arith.constant 0 : i32
    %c0_i32_0 = arith.constant 0 : i32
    %c0_i32_1 = arith.constant 0 : i32
    return %c0_i32, %c0_i32_0 : i32, i32
  }
  func.func @transform_2(%arg0: i32) -> (i32, i32) {
    %c0_i32 = arith.constant 0 : i32
    %c0_i32_0 = arith.constant 0 : i32
    %c0_i32_1 = arith.constant 0 : i32
    return %c0_i32, %c0_i32_0 : i32, i32
  }
  func.func @transform_3(%arg0: i32) -> (i32, i32) {
    %c0_i32 = arith.constant 0 : i32
    %c0_i32_0 = arith.constant 0 : i32
    %c0_i32_1 = arith.constant 0 : i32
    return %c0_i32, %c0_i32_0 : i32, i32
  }
  func.func @transform_4(%arg0: i32) -> (i32, i32) {
    %c0_i32 = arith.constant 0 : i32
    %c0_i32_0 = arith.constant 0 : i32
    %c0_i32_1 = arith.constant 0 : i32
    return %c0_i32, %c0_i32_0 : i32, i32
  }
  func.func @transform_5(%arg0: i32) -> (i32, i32) {
    %c0_i32 = arith.constant 0 : i32
    %c0_i32_0 = arith.constant 0 : i32
    %c0_i32_1 = arith.constant 0 : i32
    return %c0_i32, %c0_i32_0 : i32, i32
  }
  func.func @transform_6(%arg0: i32) -> (i32, i32) {
    %c0_i32 = arith.constant 0 : i32
    %c0_i32_0 = arith.constant 0 : i32
    %c0_i32_1 = arith.constant 0 : i32
    return %c0_i32, %c0_i32_0 : i32, i32
  }
  func.func @transform_7(%arg0: i32) -> (i32, i32) {
    %c0_i32 = arith.constant 0 : i32
    %c0_i32_0 = arith.constant 0 : i32
    %c0_i32_1 = arith.constant 0 : i32
    return %c0_i32, %c0_i32_0 : i32, i32
  }
  func.func @transform_8(%arg0: i32) -> (i32, i32) {
    %c0_i32 = arith.constant 0 : i32
    %c0_i32_0 = arith.constant 0 : i32
    return %arg0, %c0_i32 : i32, i32
  }
}

</mosaic_0001>

<bundles_post_ra>
// kernel: audionet_pallas.1
= control target key start
LH: loop header
LB: loop body
LE: loop exit
PB: predicated region body
PF: predicated region fallthrough
CT: control target
= control target key end

     0   :  { %13 = vsyncpa [#allocation3], 0  ;;  %s2095_s0 = inlined_call_operand.vmem [shape: f32[64,464], index: 0, kind: input, shape index: {}]   ;;  %s2096_s1 = inlined_call_operand.vmem [shape: f32[464,256], index: 1, kind: input, shape index: {}]   ;;  %s2097_s2 = inlined_call_operand.vmem [shape: f32[256,128], index: 2, kind: input, shape index: {}]   ;;  %s2098_s3 = inlined_call_operand.vmem [shape: f32[128,128], index: 3, kind: input, shape index: {}]   ;;  %s2099_s4 = inlined_call_operand.vmem [shape: f32[128,64], index: 4, kind: input, shape index: {}]   ;;  %s2100_s5 = inlined_call_operand.vmem [shape: f32[64,64], index: 5, kind: input, shape index: {}]   ;;  %s2101_s6 = inlined_call_operand.vmem [shape: f32[64,64], index: 6, kind: input, shape index: {}]   ;;  %s2102_s7 = inlined_call_operand.vmem [shape: f32[6,256], index: 7, kind: input, shape index: {}]   ;;  %s2103_s8 = inlined_call_operand.hbm [shape: f32[64,64], index: 8, kind: output, shape index: {}]  }
   0x1   :  { %15 = vsyncpa [#allocation3 + $0x1], 0  ;;  %s1298_s27 = smov 0   ;;  %s1300_s28 = smov 0  }
   0x2   :  { %s1302_s29 = smov 0   ;;  %s1304_s30 = smov 0  }
   0x3 LB: > { %s1319_s9 = sadd.s32 4294967295, %s1249_s30   ;;  %s1107_s10 = sadd.s32 4294967294, %s1249_s30   ;;  %s1249_s30 = sphi %s1304_s30, %s2110_s30   ;;  %s1245_s29 = sphi %s1302_s29, %s2109_s29   ;;  %s1241_s28 = sphi %s1300_s28, %s2108_s28   ;;  %s1237_s27 = sphi %s1298_s27, %s2107_s27  }
   0x4   : > { %s1323_s11 = sadd.s32 1, %s1249_s30   ;;  %s201_s12 = sadd.s32 1, %s1245_s29 }
   0x5   : > { %s198_s13 = ssub.s32 %s1249_s30, %s1323_s11  ;;  %p211_p0 = scmp.ne.s32.totalorder %s1245_s29, %s1241_s28 }
   0x6   : > { %p199_p1 = scmp.eq.s32.totalorder %s198_s13, 0  ;;  %p212_p2 = scmp.eq.s32.totalorder %s1319_s9, 1 }
   0x7   : > { %p217_p3 = scmp.ne.s32.totalorder %s1241_s28, %s1237_s27  ;;  %p218_p4 = scmp.eq.s32.totalorder %s1107_s10, 1 }
   0x8   : > { %s1334_s14 = scalar_select %p199_p1, %s1245_s29, %s201_s12  }
   0x9   : > { %p1336_p5 = por %p212_p2, %p211_p0  ;;  %p1340_p6 = por %p218_p4, %p217_p3 }
   0xa   : > { %p1110_p7 = scmp.ge.s32.totalorder %s1249_s30, 1  ;;  %p267_p8 = scmp.lt.s32.totalorder %s1249_s30, 3 }
   0xc   : > { %p268_p9 = pnand %p1110_p7, %p267_p8 }
   0xd   : > { %s1112_s17 = sshll.u32 (!%p268_p9), %s1319_s9, 2  ;;  %s299_s25 = sand.u32 (!%p268_p9), 1, %s1241_s28  }
   0xe   : > { %271 = sbr.rel (%p268_p9) target bundleno = 921 (0x399), region = 52  ;;  %p1406_p10 = scmp.lt.s32.totalorder (!%p268_p9), %s1112_s17, 7 }
   0xf   : > { %s1137_s13 = sshll.u32 (!%p268_p9), %s1319_s9, 5  ;;  %s1030_s24 = scalar_lea.sflag (!%p268_p9), [#allocation3], %s299_s25 }
  0x10   : > { %s1041_s21 = scalar_lea.hbm (!%p268_p9), %s2103_s8, %s1137_s13  ;;  %s1207_s26 = scalar_lea.hbm (!%p268_p9), %s2103_s8, 64 }
  0x11   : > { %s1044_s23 = sshll.u32 (!%p268_p9), %s1041_s21, 4  ;;  %s1045_s23 = int_to_ptr.hbm [resolvable:$true] %s1044_s23 }
  0x13   : > { %v420_v0 = vld [vmem:[%s2096_s1 + $0x2f0] sm:$0xff]  ;;  %v418_v2 = vld [vmem:[%s2096_s1 + $0x2e0] sm:$0xff]  ;;  %s2112_s17 = smov (!%p1406_p10, %s1112_s17), 7  ;;  %vm448_vm0 = vcmask 654336   ;;  %v357_v48 = vld [vmem:[%s2096_s1 + $0xf8] sm:$0xff]  ;;  %vm925_vm1 = vcmask 523264  }
  0x14   : > { %v356_v1 = vld [vmem:[%s2096_s1 + $0xf0] sm:$0xff]  ;;  %519 = vmatpush.msra.mxu2 %v420_v0  ;;  %v354_v3 = vld [vmem:[%s2096_s1 + $0xe0] sm:$0xff]  ;;  %s1136_s12 = sshll.u32 %s2112_s17, 5  ;;  %v355_v52 = vld [vmem:[%s2096_s1 + $0xe8] sm:$0xff]  ;;  %s1201_s17 = sshra.s32 %s1045_s23, 4  ;;  %s1202_s17 = int_to_ptr.hbm [resolvable:$true] %s1201_s17 }
  0x15   : > { %461 = vmatpush.msra.mxu0 %v356_v1  ;;  %v388_v4 = vld [vmem:[%s2096_s1 + $0x1f0] sm:$0xff]  ;;  %v386_v7 = vld [vmem:[%s2096_s1 + $0x1e0] sm:$0xff]  ;;  %s1486_s19 = scalar_lea.vmem %s2095_s0, %s1136_s12  ;;  %v353_v56 = vld [vmem:[%s2096_s1 + $0xd8] sm:$0xff]  ;;  %s1111_s12 = sshll.u32 %s299_s25, 5 }
  0x16   : > { %490 = vmatpush.msra.mxu1 %v388_v4  ;;  %v416_v5 = vld [vmem:[%s2096_s1 + $0x2d0] sm:$0xff]  ;;  %520 = vmatpush.msra.mxu2 %v418_v2  ;;  %v414_v10 = vld [vmem:[%s2096_s1 + $0x2c0] sm:$0xff]  ;;  %v1501_v45 = vld [vmem:[%s1486_s19 + $0x18] sm:$0xff]  ;;  %s301_s10 = scalar_lea.vmem [#allocation2], %s1111_s12  ;;  %s1203_s9 = scalar_lea.hbm %s1202_s17, 32 }
  0x17   : > { %v352_v6 = vld [vmem:[%s2096_s1 + $0xd0] sm:$0xff]  ;;  %462 = vmatpush.msra.mxu0 %v354_v3  ;;  %v350_v11 = vld [vmem:[%s2096_s1 + $0xc0] sm:$0xff]  ;;  %v351_v60 = vld [vmem:[%s2096_s1 + $0xc8] sm:$0xff]  ;;  %s1042_s22 = sshll.u32 %s301_s10, 4  ;;  %p1204_p11 = scmp.ne.s32.totalorder %s1202_s17, %s1203_s9  ;;  %s1043_s22 = int_to_ptr.vmem [resolvable:$true] %s1042_s22 }
  0x18   : > { %v440_v8 = vld [vmem:[%s2096_s1 + $0x390] sm:$0xff]  ;;  %491 = vmatpush.msra.mxu1 %v386_v7  ;;  %v438_v12 = vld [vmem:[%s2096_s1 + $0x380] sm:$0xff]  ;;  %521 = vmatpush.msra.mxu2 %v416_v5  ;;  %v441_v63 = vld [vmem:[%s2096_s1 + $0x398] sm:$0xff]  ;;  %p1208_p0 = scmp.lt.s32.totalorder %s1202_s17, %s2103_s8  ;;  %p1209_p1 = scmp.lt.s32.totalorder %s1207_s26, %s1203_s9 }
  0x19   : > { %v384_v9 = vld [vmem:[%s2096_s1 + $0x1d0] sm:$0xff]  ;;  %554 = vmatpush.msra.mxu3 %v440_v8  ;;  %463 = vmatpush.msra.mxu0 %v352_v6  ;;  %v382_v13 = vld [vmem:[%s2096_s1 + $0x1c0] sm:$0xff]  ;;  %v1563_v1 = vld [vmem:[%s1486_s19 + $0x38] sm:$0xff]  ;;  %p1205_p12 = pnand %p1204_p11, %p1336_p5 }
  0x1a   : > { %v436_v14 = vld [vmem:[%s2096_s1 + $0x370] sm:$0xff]  ;;  %492 = vmatpush.msra.mxu1 %v384_v9  ;;  %522 = vmatpush.msra.mxu2 %v414_v10  ;;  %v434_v18 = vld [vmem:[%s2096_s1 + $0x360] sm:$0xff]  ;;  %v389_v2 = vld [vmem:[%s2096_s1 + $0x1f8] sm:$0xff]  ;;  %p1210_p2 = por %p1209_p1, %p1208_p0 }
  0x1b   : > { %v412_v15 = vld [vmem:[%s2096_s1 + $0x2b0] sm:$0xff]  ;;  %555 = vmatpush.msra.mxu3 %v438_v12  ;;  %464 = vmatpush.msra.mxu0 %v350_v11  ;;  %v410_v19 = vld [vmem:[%s2096_s1 + $0x2a0] sm:$0xff]  ;;  %v349_v3 = vld [vmem:[%s2096_s1 + $0xb8] sm:$0xff]  ;;  %p1206_p13 = pneg %p1205_p12 }
  0x1c   : > { %v348_v16 = vld [vmem:[%s2096_s1 + $0xb0] sm:$0xff]  ;;  %493 = vmatpush.msra.mxu1 %v382_v13  ;;  %v346_v20 = vld [vmem:[%s2096_s1 + $0xa0] sm:$0xff]  ;;  %523 = vmatpush.msra.mxu2 %v412_v15  ;;  %v1577_v5 = vld [vmem:[%s1486_s19 + $0x8] sm:$0xff] }
  0x1d   : > { %v380_v17 = vld [vmem:[%s2096_s1 + $0x1b0] sm:$0xff]  ;;  %556 = vmatpush.msra.mxu3 %v436_v14  ;;  %465 = vmatpush.msra.mxu0 %v348_v16  ;;  %v378_v21 = vld [vmem:[%s2096_s1 + $0x1a0] sm:$0xff]  ;;  %v387_v6 = vld [vmem:[%s2096_s1 + $0x1e8] sm:$0xff]  ;;  %p1211_p3 = pnand %p1210_p2, %p1206_p13 }
  0x1e   : > { %v432_v22 = vld [vmem:[%s2096_s1 + $0x350] sm:$0xff]  ;;  %494 = vmatpush.msra.mxu1 %v380_v17  ;;  %524 = vmatpush.msra.mxu2 %v410_v19  ;;  %v430_v26 = vld [vmem:[%s2096_s1 + $0x340] sm:$0xff]  ;;  %v347_v7 = vld [vmem:[%s2096_s1 + $0xa8] sm:$0xff] }
  0x1f   : > { %v408_v23 = vld [vmem:[%s2096_s1 + $0x290] sm:$0xff]  ;;  %557 = vmatpush.msra.mxu3 %v434_v18  ;;  %466 = vmatpush.msra.mxu0 %v346_v20  ;;  %v406_v27 = vld [vmem:[%s2096_s1 + $0x280] sm:$0xff]  ;;  %v421_v8 = vld [vmem:[%s2096_s1 + $0x2f8] sm:$0xff] }
  0x20   : > { %v344_v24 = vld [vmem:[%s2096_s1 + $0x90] sm:$0xff]  ;;  %495 = vmatpush.msra.mxu1 %v378_v21  ;;  %v342_v28 = vld [vmem:[%s2096_s1 + $0x80] sm:$0xff]  ;;  %525 = vmatpush.msra.mxu2 %v408_v23  ;;  %v439_v9 = vld [vmem:[%s2096_s1 + $0x388] sm:$0xff] }
  0x21   : > { %v376_v25 = vld [vmem:[%s2096_s1 + $0x190] sm:$0xff]  ;;  %558 = vmatpush.msra.mxu3 %v432_v22  ;;  %467 = vmatpush.msra.mxu0 %v344_v24  ;;  %v374_v29 = vld [vmem:[%s2096_s1 + $0x180] sm:$0xff]  ;;  %v385_v10 = vld [vmem:[%s2096_s1 + $0x1d8] sm:$0xff] }
  0x22   : > { %v428_v30 = vld [vmem:[%s2096_s1 + $0x330] sm:$0xff]  ;;  %496 = vmatpush.msra.mxu1 %v376_v25  ;;  %526 = vmatpush.msra.mxu2 %v406_v27  ;;  %v426_v34 = vld [vmem:[%s2096_s1 + $0x320] sm:$0xff]  ;;  %v345_v11 = vld [vmem:[%s2096_s1 + $0x98] sm:$0xff] }
  0x23   : > { %v404_v31 = vld [vmem:[%s2096_s1 + $0x270] sm:$0xff]  ;;  %559 = vmatpush.msra.mxu3 %v430_v26  ;;  %468 = vmatpush.msra.mxu0 %v342_v28  ;;  %v402_v35 = vld [vmem:[%s2096_s1 + $0x260] sm:$0xff]  ;;  %v419_v12 = vld [vmem:[%s2096_s1 + $0x2e8] sm:$0xff] }
  0x24   : > { %v340_v32 = vld [vmem:[%s2096_s1 + $0x70] sm:$0xff]  ;;  %497 = vmatpush.msra.mxu1 %v374_v29  ;;  %v338_v36 = vld [vmem:[%s2096_s1 + $0x60] sm:$0xff]  ;;  %527 = vmatpush.msra.mxu2 %v404_v31  ;;  %v437_v13 = vld [vmem:[%s2096_s1 + $0x378] sm:$0xff] }
  0x25   : > { %v372_v33 = vld [vmem:[%s2096_s1 + $0x170] sm:$0xff]  ;;  %560 = vmatpush.msra.mxu3 %v428_v30  ;;  %469 = vmatpush.msra.mxu0 %v340_v32  ;;  %v370_v37 = vld [vmem:[%s2096_s1 + $0x160] sm:$0xff]  ;;  %v383_v14 = vld [vmem:[%s2096_s1 + $0x1c8] sm:$0xff] }
  0x26   : > { %v424_v38 = vld [vmem:[%s2096_s1 + $0x310] sm:$0xff]  ;;  %498 = vmatpush.msra.mxu1 %v372_v33  ;;  %528 = vmatpush.msra.mxu2 %v402_v35  ;;  %v422_v42 = vld [vmem:[%s2096_s1 + $0x300] sm:$0xff]  ;;  %v343_v16 = vld [vmem:[%s2096_s1 + $0x88] sm:$0xff] }
  0x27   : > { %v400_v39 = vld [vmem:[%s2096_s1 + $0x250] sm:$0xff]  ;;  %561 = vmatpush.msra.mxu3 %v426_v34  ;;  %470 = vmatpush.msra.mxu0 %v338_v36  ;;  %v398_v43 = vld [vmem:[%s2096_s1 + $0x240] sm:$0xff]  ;;  %v417_v17 = vld [vmem:[%s2096_s1 + $0x2d8] sm:$0xff] }
  0x28   : > { %v336_v40 = vld [vmem:[%s2096_s1 + $0x50] sm:$0xff]  ;;  %499 = vmatpush.msra.mxu1 %v370_v37  ;;  %v334_v44 = vld [vmem:[%s2096_s1 + $0x40] sm:$0xff]  ;;  %529 = vmatpush.msra.mxu2 %v400_v39  ;;  %v1622_v19 = vld [vmem:[%s1486_s19 + $0x58] sm:$0xff] }
  0x29   : > { %v368_v41 = vld [vmem:[%s2096_s1 + $0x150] sm:$0xff]  ;;  %562 = vmatpush.msra.mxu3 %v424_v38  ;;  %471 = vmatpush.msra.mxu0 %v336_v40  ;;  %v366_v46 = vld [vmem:[%s2096_s1 + $0x140] sm:$0xff]  ;;  %v381_v20 = vld [vmem:[%s2096_s1 + $0x1b8] sm:$0xff] }
  0x2a   : > { %500 = vmatpush.msra.mxu1 %v368_v41  ;;  %v396_v47 = vld [vmem:[%s2096_s1 + $0x230] sm:$0xff]  ;;  %530 = vmatpush.msra.mxu2 %v398_v43  ;;  %v394_v51 = vld [vmem:[%s2096_s1 + $0x220] sm:$0xff]  ;;  %v341_v21 = vld [vmem:[%s2096_s1 + $0x78] sm:$0xff] }
  0x2b   : > { %563 = vmatpush.msra.mxu3 %v422_v42  ;;  %472 = vmatpush.msra.mxu0 %v334_v44  ;;  %v332_v49 = vld [vmem:[%s2096_s1 + $0x30] sm:$0xff]  ;;  %v330_v53 = vld [vmem:[%s2096_s1 + $0x20] sm:$0xff]  ;;  %v415_v22 = vld [vmem:[%s2096_s1 + $0x2c8] sm:$0xff] }
  0x2c   : > { %v364_v50 = vld [vmem:[%s2096_s1 + $0x130] sm:$0xff]  ;;  %1115 = vmatmul.msk.f32.vlgmr.msra.gmra.mxu3 %vm448_vm0, %v1501_v45  ;;  %501 = vmatpush.msra.mxu1 %v366_v46  ;;  %v362_v54 = vld [vmem:[%s2096_s1 + $0x120] sm:$0xff]  ;;  %v435_v23 = vld [vmem:[%s2096_s1 + $0x368] sm:$0xff] }
  0x2d   : > { %531 = vmatpush.msra.mxu2 %v396_v47  ;;  %577 = vmatpush.msrb.mxu3 %v357_v48  ;;  %v392_v55 = vld [vmem:[%s2096_s1 + $0x210] sm:$0xff]  ;;  %v390_v59 = vld [vmem:[%s2096_s1 + $0x200] sm:$0xff]  ;;  %v1639_v24 = vld [vmem:[%s1486_s19 + $0x28] sm:$0xff] }
  0x2e   : > { %473 = vmatpush.msra.mxu0 %v332_v49  ;;  %502 = vmatpush.msra.mxu1 %v364_v50  ;;  %v328_v57 = vld [vmem:[%s2096_s1 + $0x10] sm:$0xff]  ;;  %v326_v62 = vld [vmem:[%s2096_s1] sm:$0xff]  ;;  %v339_v25 = vld [vmem:[%s2096_s1 + $0x68] sm:$0xff] }
  0x2f   : > { %532 = vmatpush.msra.mxu2 %v394_v51  ;;  %578 = vmatpush.msrb.mxu3 %v355_v52  ;;  %v360_v58 = vld [vmem:[%s2096_s1 + $0x110] sm:$0xff]  ;;  %v1560_v0 = vld [vmem:[%s1486_s19] sm:$0xff]  ;;  %v379_v26 = vld [vmem:[%s2096_s1 + $0x1a8] sm:$0xff] }
  0x30   : > { %474 = vmatpush.msra.mxu0 %v330_v53  ;;  %503 = vmatpush.msra.mxu1 %v362_v54  ;;  %v1551_v61 = vld [vmem:[%s1486_s19 + $0x10] sm:$0xff]  ;;  %v358_v4 = vld [vmem:[%s2096_s1 + $0x100] sm:$0xff]  ;;  %v413_v27 = vld [vmem:[%s2096_s1 + $0x2b8] sm:$0xff] }
  0x31   : > { %533 = vmatpush.msra.mxu2 %v392_v55  ;;  %579 = vmatpush.msrb.mxu3 %v353_v56  ;;  %v1610_v15 = vld [vmem:[%s1486_s19 + $0x30] sm:$0xff]  ;;  %v1619_v18 = vld [vmem:[%s1486_s19 + $0x20] sm:$0xff]  ;;  %v433_v28 = vld [vmem:[%s2096_s1 + $0x358] sm:$0xff] }
  0x32   : > { %475 = vmatpush.msra.mxu0 %v328_v57  ;;  %504 = vmatpush.msra.mxu1 %v360_v58  ;;  %v337_v29 = vld [vmem:[%s2096_s1 + $0x58] sm:$0xff]  ;;  %v411_v31 = vld [vmem:[%s2096_s1 + $0x2a8] sm:$0xff]  ;;  %v1666_v32 = vld [vmem:[%s1486_s19 + $0x50] sm:$0xff] }
  0x33   : > { %534 = vmatpush.msra.mxu2 %v390_v59  ;;  %580 = vmatpush.msrb.mxu3 %v351_v60  ;;  %v377_v30 = vld [vmem:[%s2096_s1 + $0x198] sm:$0xff]  ;;  %v335_v33 = vld [vmem:[%s2096_s1 + $0x48] sm:$0xff]  ;;  %v1682_v37 = vld [vmem:[%s1486_s19 + $0x40] sm:$0xff] }
  0x34   : > { %535 = vmatmul.f32.vlgmr.msra.gmra.mxu2 %v1551_v61  ;;  %476 = vmatpush.msra.mxu0 %v326_v62  ;;  %v375_v34 = vld [vmem:[%s2096_s1 + $0x188] sm:$0xff]  ;;  %v409_v35 = vld [vmem:[%s2096_s1 + $0x298] sm:$0xff]  ;;  %v1728_v52 = vld [vmem:[%s1486_s19 + $0x70] sm:$0xff] }
  0x35   : > { %670 = vmatpush.msrb.mxu2 %v441_v63  ;;  %477 = vmatmul.f32.vlgmr.msra.gmra.mxu0 %v1560_v0  ;;  %v431_v36 = vld [vmem:[%s2096_s1 + $0x348] sm:$0xff]  ;;  %v1685_v38 = vld [vmem:[%s1486_s19 + $0x78] sm:$0xff]  ;;  %v322_v56 = vld [vmem:[%s1486_s19 + $0x60] sm:$0xff] }
  0x36   : > { %1116 = vmatmul.msk.f32.gmra.mxu3 %vm448_vm0, %v1563_v1  ;;  %606 = vmatpush.msrb.mxu0 %v389_v2  ;;  %v333_v39 = vld [vmem:[%s2096_s1 + $0x38] sm:$0xff]  ;;  %v407_v41 = vld [vmem:[%s2096_s1 + $0x288] sm:$0xff] }
  0x37   : > { %581 = vmatpush.msrb.mxu3 %v349_v3  ;;  %505 = vmatpush.msra.mxu1 %v358_v4  ;;  %v373_v40 = vld [vmem:[%s2096_s1 + $0x178] sm:$0xff]  ;;  %v1703_v43 = vld [vmem:[%s1486_s19 + $0x48] sm:$0xff] }
  0x38   : > { %506 = vmatmul.f32.vlgmr.msra.gmra.mxu1 %v1577_v5  ;;  %607 = vmatpush.msrb.mxu0 %v387_v6  ;;  %v429_v42 = vld [vmem:[%s2096_s1 + $0x338] sm:$0xff]  ;;  %v331_v44 = vld [vmem:[%s2096_s1 + $0x28] sm:$0xff]  ;;  %v723_v6 = vld [vmem:[%s2097_s2 + $0x70] sm:$0xff] }
  0x39   : > { %582 = vmatpush.msrb.mxu3 %v347_v7  ;;  %635 = vmatpush.msrb.mxu1 %v421_v8  ;;  %v371_v46 = vld [vmem:[%s2096_s1 + $0x168] sm:$0xff]  ;;  %v405_v47 = vld [vmem:[%s2096_s1 + $0x278] sm:$0xff] }
  0x3a   : > { %671 = vmatpush.msrb.mxu2 %v439_v9  ;;  %608 = vmatpush.msrb.mxu0 %v385_v10  ;;  %v329_v48 = vld [vmem:[%s2096_s1 + $0x18] sm:$0xff]  ;;  %v427_v49 = vld [vmem:[%s2096_s1 + $0x328] sm:$0xff] }
  0x3b   : > { %583 = vmatpush.msrb.mxu3 %v345_v11  ;;  %636 = vmatpush.msrb.mxu1 %v419_v12  ;;  %v369_v50 = vld [vmem:[%s2096_s1 + $0x158] sm:$0xff]  ;;  %v403_v51 = vld [vmem:[%s2096_s1 + $0x268] sm:$0xff]  ;;  %v721_v11 = vld [vmem:[%s2097_s2 + $0x60] sm:$0xff] }
  0x3c   : > { %672 = vmatpush.msrb.mxu2 %v437_v13  ;;  %609 = vmatpush.msrb.mxu0 %v383_v14  ;;  %v327_v53 = vld [vmem:[%s2096_s1 + $0x8] sm:$0xff]  ;;  %v401_v55 = vld [vmem:[%s2096_s1 + $0x258] sm:$0xff]  ;;  %v719_v12 = vld [vmem:[%s2097_s2 + $0x50] sm:$0xff] }
  0x3d   : > { %538 = vmatmul.f32.gmra.mxu2 %v1610_v15  ;;  %584 = vmatpush.msrb.mxu3 %v343_v16  ;;  %v367_v54 = vld [vmem:[%s2096_s1 + $0x148] sm:$0xff]  ;;  %v365_v57 = vld [vmem:[%s2096_s1 + $0x138] sm:$0xff]  ;;  %v715_v13 = vld [vmem:[%s2097_s2 + $0x30] sm:$0xff] }
  0x3e   : > { %637 = vmatpush.msrb.mxu1 %v417_v17  ;;  %480 = vmatmul.f32.gmra.mxu0 %v1619_v18  ;;  %v399_v58 = vld [vmem:[%s2096_s1 + $0x248] sm:$0xff]  ;;  %v425_v59 = vld [vmem:[%s2096_s1 + $0x318] sm:$0xff]  ;;  %v711_v17 = vld [vmem:[%s2097_s2 + $0x10] sm:$0xff] }
  0x3f   : > { %1117 = vmatmul.msk.f32.gmra.mxu3 %vm448_vm0, %v1622_v19  ;;  %610 = vmatpush.msrb.mxu0 %v381_v20  ;;  %v323_v60 = vld [vmem:[%s1486_s19 + $0x68] sm:$0xff]  ;;  %v397_v63 = vld [vmem:[%s2096_s1 + $0x238] sm:$0xff]  ;;  %v709_v20 = vld [vmem:[%s2097_s2] sm:$0xff] }
  0x40   : > { %585 = vmatpush.msrb.mxu3 %v341_v21  ;;  %638 = vmatpush.msrb.mxu1 %v415_v22  ;;  %v363_v62 = vld [vmem:[%s2096_s1 + $0x128] sm:$0xff]  ;;  %v724_v4 = vld [vmem:[%s2097_s2 + $0x78] sm:$0xff]  ;;  %v739_v21 = vld [vmem:[%s2097_s2 + $0xf0] sm:$0xff] }
  0x41   : > { %673 = vmatpush.msrb.mxu2 %v435_v23  ;;  %509 = vmatmul.f32.gmra.mxu1 %v1639_v24  ;;  %v423_v2 = vld [vmem:[%s2096_s1 + $0x308] sm:$0xff]  ;;  %v393_v8 = vld [vmem:[%s2096_s1 + $0x218] sm:$0xff]  ;;  %v737_v23 = vld [vmem:[%s2097_s2 + $0xe0] sm:$0xff] }
  0x42   : > { %586 = vmatpush.msrb.mxu3 %v339_v25  ;;  %611 = vmatpush.msrb.mxu0 %v379_v26  ;;  %v395_v3 = vld [vmem:[%s2096_s1 + $0x228] sm:$0xff]  ;;  %v712_v16 = vld [vmem:[%s2097_s2 + $0x18] sm:$0xff]  ;;  %v735_v25 = vld [vmem:[%s2097_s2 + $0xd0] sm:$0xff] }
  0x43   : > { %639 = vmatpush.msrb.mxu1 %v413_v27  ;;  %674 = vmatpush.msrb.mxu2 %v433_v28  ;;  %v359_v7 = vld [vmem:[%s2096_s1 + $0x108] sm:$0xff] }
  0x44   : > { %587 = vmatpush.msrb.mxu3 %v337_v29  ;;  %612 = vmatpush.msrb.mxu0 %v377_v30  ;;  %v391_v9 = vld [vmem:[%s2096_s1 + $0x208] sm:$0xff]  ;;  %v733_v30 = vld [vmem:[%s2097_s2 + $0xc0] sm:$0xff] }
  0x45   : > { %640 = vmatpush.msrb.mxu1 %v411_v31  ;;  %541 = vmatmul.f32.gmra.mxu2 %v1666_v32  ;;  %v722_v10 = vld [vmem:[%s2097_s2 + $0x68] sm:$0xff]  ;;  %v732_v31 = vld [vmem:[%s2097_s2 + $0xb8] sm:$0xff] }
  0x46   : > { %588 = vmatpush.msrb.mxu3 %v335_v33  ;;  %613 = vmatpush.msrb.mxu0 %v375_v34  ;;  %v714_v14 = vld [vmem:[%s2097_s2 + $0x28] sm:$0xff]  ;;  %v731_v34 = vld [vmem:[%s2097_s2 + $0xb0] sm:$0xff] }
  0x47   : > { %641 = vmatpush.msrb.mxu1 %v409_v35  ;;  %675 = vmatpush.msrb.mxu2 %v431_v36  ;;  %v738_v22 = vld [vmem:[%s2097_s2 + $0xe8] sm:$0xff] }
  0x48   : > { %483 = vmatmul.f32.gmra.mxu0 %v1682_v37  ;;  %1118 = vmatmul.msk.f32.gmra.mxu3 %vm448_vm0, %v1685_v38  ;;  %v442_v26 = vld [vmem:[%s2102_s7] ss:$8 sm:$0x3] }
  0x49   : > { %589 = vmatpush.msrb.mxu3 %v333_v39  ;;  %614 = vmatpush.msrb.mxu0 %v373_v40  ;;  %v734_v27 = vld [vmem:[%s2097_s2 + $0xc8] sm:$0xff]  ;;  %v444_v29 = vperm.slane %v442_v26, 0  ;;  %v729_v39 = vld [vmem:[%s2097_s2 + $0xa0] sm:$0xff] }
  0x4a   : > { %642 = vmatpush.msrb.mxu1 %v407_v41  ;;  %676 = vmatpush.msrb.mxu2 %v429_v42  ;;  %v730_v36 = vld [vmem:[%s2097_s2 + $0xa8] sm:$0xff]  ;;  %v728_v42 = vld [vmem:[%s2097_s2 + $0x98] sm:$0xff] }
  0x4b   : > { %512 = vmatmul.f32.gmra.mxu1 %v1703_v43  ;;  %590 = vmatpush.msrb.mxu3 %v331_v44 }
  0x4c   : > { %615 = vmatpush.msrb.mxu0 %v371_v46  ;;  %643 = vmatpush.msrb.mxu1 %v405_v47  ;;  %v727_v46 = vld [vmem:[%s2097_s2 + $0x90] sm:$0xff] }
  0x4d   : > { %591 = vmatpush.msrb.mxu3 %v329_v48  ;;  %677 = vmatpush.msrb.mxu2 %v427_v49  ;;  %v726_v49 = vld [vmem:[%s2097_s2 + $0x88] sm:$0xff] }
  0x4e   : > { %616 = vmatpush.msrb.mxu0 %v369_v50  ;;  %644 = vmatpush.msrb.mxu1 %v403_v51 }
  0x4f   : > { %544 = vmatmul.f32.gmra.mxu2 %v1728_v52  ;;  %592 = vmatpush.msrb.mxu3 %v327_v53  ;;  %v725_v53 = vld [vmem:[%s2097_s2 + $0x80] sm:$0xff] }
  0x50   : > { %617 = vmatpush.msrb.mxu0 %v367_v54  ;;  %645 = vmatpush.msrb.mxu1 %v401_v55 }
  0x51   : > { %486 = vmatmul.f32.gmra.mxu0 %v322_v56  ;;  %593 = vmatmul.f32.vlgmr.msrb.gmra.mxu3 %v1560_v0  ;;  %v361_v0 = vld [vmem:[%s2096_s1 + $0x118] sm:$0xff] }
  0x52   : > { %618 = vmatpush.msrb.mxu0 %v365_v57  ;;  %646 = vmatpush.msrb.mxu1 %v399_v58 }
  0x53   : > { %678 = vmatpush.msrb.mxu2 %v425_v59  ;;  %515 = vmatmul.f32.gmra.mxu1 %v323_v60 }
  0x54   : > { %619 = vmatpush.msrb.mxu0 %v363_v62  ;;  %647 = vmatpush.msrb.mxu1 %v397_v63 }
  0x55   : > { %679 = vmatpush.msrb.mxu2 %v423_v2  ;;  %742 = vmatpush.msra.mxu3 %v724_v4 }
  0x56   : > { %620 = vmatpush.msrb.mxu0 %v361_v0  ;;  %648 = vmatpush.msrb.mxu1 %v395_v3 }
  0x57   : > { %1119 = vmatmul.msk.f32.vlgmr.msrb.gmra.mxu2 %vm448_vm0, %v1501_v45  ;;  %743 = vmatpush.msra.mxu3 %v723_v6  ;;  %v720_v45 = vld [vmem:[%s2097_s2 + $0x58] sm:$0xff] }
  0x58   : > { %621 = vmatpush.msrb.mxu0 %v359_v7  ;;  %649 = vmatpush.msrb.mxu1 %v393_v8 }
  0x59   : > { %596 = vmatmul.f32.gmra.mxu3 %v1619_v18  ;;  %622 = vmatmul.f32.vlgmr.msrb.gmra.mxu0 %v1577_v5  ;;  %v718_v5 = vld [vmem:[%s2097_s2 + $0x48] sm:$0xff] }
  0x5a   : > { %650 = vmatpush.msrb.mxu1 %v391_v9  ;;  %744 = vmatpush.msra.mxu3 %v722_v10  ;;  %v710_v18 = vld [vmem:[%s2097_s2 + $0x8] sm:$0xff] }
  0x5b   : > { %651 = vmatmul.f32.vlgmr.msrb.gmra.mxu1 %v1551_v61  ;;  %v717_v61 = vld [vmem:[%s2097_s2 + $0x40] sm:$0xff] }
  0x5c   : > { %745 = vmatpush.msra.mxu3 %v721_v11 }
  0x5e   : > { %746 = vmatpush.msra.mxu3 %v720_v45 }
  0x5f   : > { %1120 = vmatmul.msk.f32.gmra.mxu2 %vm448_vm0, %v1563_v1  ;;  %v716_v1 = vld [vmem:[%s2097_s2 + $0x38] sm:$0xff] }
  0x60   : > { %747 = vmatpush.msra.mxu3 %v719_v12  ;;  %v445_v12 = vperm.slane %v442_v26, 1 }
  0x61   : > { %599 = vmatmul.f32.gmra.mxu3 %v1682_v37  ;;  %625 = vmatmul.f32.gmra.mxu0 %v1639_v24  ;;  %v736_v24 = vld [vmem:[%s2097_s2 + $0xd8] sm:$0xff] }
  0x62   : > { %748 = vmatpush.msra.mxu3 %v718_v5 }
  0x63   : > { %654 = vmatmul.f32.gmra.mxu1 %v1610_v15  ;;  %v713_v15 = vld [vmem:[%s2097_s2 + $0x20] sm:$0xff] }
  0x64   : > { %749 = vmatpush.msra.mxu3 %v717_v61 }
  0x66   : > { %750 = vmatpush.msra.mxu3 %v716_v1 }
  0x67   : > { %1121 = vmatmul.msk.f32.gmra.mxu2 %vm448_vm0, %v1622_v19  ;;  %v740_v19 = vld [vmem:[%s2097_s2 + $0xf8] sm:$0xff] }
  0x68   : > { %751 = vmatpush.msra.mxu3 %v715_v13  ;;  %771 = vmatpush.msra.mxu0 %v740_v19 }
  0x69   : > { %602 = vmatmul.f32.gmra.mxu3 %v322_v56  ;;  %628 = vmatmul.f32.gmra.mxu0 %v1703_v43 }
  0x6a   : > { %752 = vmatpush.msra.mxu3 %v714_v14  ;;  %772 = vmatpush.msra.mxu0 %v739_v21  ;;  %v823_v21 = vld [vmem:[%s2098_s3 + $0x78] sm:$0xff] }
  0x6b   : > { %657 = vmatmul.f32.gmra.mxu1 %v1666_v32 }
  0x6c   : > { %753 = vmatpush.msra.mxu3 %v713_v15  ;;  %773 = vmatpush.msra.mxu0 %v738_v22 }
  0x6d   : > { %825 = vmatpush.msra.mxu1 %v823_v21  ;;  %v872_v21 = vld [vmem:[%s2099_s4 + $0x50] sm:$0xff] }
  0x6e   : > { %754 = vmatpush.msra.mxu3 %v712_v16  ;;  %774 = vmatpush.msra.mxu0 %v737_v23 }
  0x6f   : > { %1122 = vmatmul.msk.f32.gmra.mxu2 %vm448_vm0, %v1685_v38 }
  0x70   : > { %755 = vmatpush.msra.mxu3 %v711_v17  ;;  %775 = vmatpush.msra.mxu0 %v736_v24 }
  0x71   : > { %631 = vmatmul.f32.gmra.mxu0 %v323_v60 }
  0x72   : > { %756 = vmatpush.msra.mxu3 %v710_v18  ;;  %776 = vmatpush.msra.mxu0 %v735_v25 }
  0x73   : > { %660 = vmatmul.f32.gmra.mxu1 %v1728_v52 }
  0x74   : > { %757 = vmatpush.msra.mxu3 %v709_v20  ;;  %777 = vmatpush.msra.mxu0 %v734_v27 }
  0x76   : > { %778 = vmatpush.msra.mxu0 %v733_v30 }
  0x78   : > { %779 = vmatpush.msra.mxu0 %v732_v31 }
  0x7a   : > { %780 = vmatpush.msra.mxu0 %v731_v34 }
  0x7c   : > { %781 = vmatpush.msra.mxu0 %v730_v36 }
  0x7e   : > { %782 = vmatpush.msra.mxu0 %v729_v39 }
  0x80   : > { %783 = vmatpush.msra.mxu0 %v728_v42 }
  0x82   : > { %784 = vmatpush.msra.mxu0 %v727_v46 }
  0x84   : > { %785 = vmatpush.msra.mxu0 %v726_v49 }
  0x86   : > { %786 = vmatpush.msra.mxu0 %v725_v53 }
  0xaf   : > { %v565_v28 = vpop.f32.mrf.mxu3 }
  0xb2   : > { %v478_v32 = vpop.f32.mrf.mxu0 }
  0xb3   : > { %v479_v33 = vadd.f32 %v478_v32, %v444_v29 }
  0xb5   : > { %v507_v35 = vpop.f32.mrf.mxu1 }
  0xb6   : > { %v508_v37 = vadd.f32 %v507_v35, %v479_v33 }
  0xb7   : > { %v536_v38 = vpop.f32.mrf.mxu2 }
  0xb8   : > { %v537_v40 = vadd.f32 %v536_v38, %v508_v37 }
  0xb9   : > { %v568_v41 = vpop.f32.mrf.mxu3 }
  0xba   : > { %v566_v43 = vadd.f32 %v565_v28, %v537_v40 }
  0xbb   : > { %v481_v44 = vpop.f32.mrf.mxu0 }
  0xbc   : > { %v693_v47 = vmul.f32 0.02, %v566_v43  ;;  %v482_v48 = vadd.f32 %v481_v44, %v444_v29 }
  0xbe   : > { %v701_v50 = vmax.f32 %v566_v43, %v693_v47  ;;  %v510_v51 = vpop.f32.mrf.mxu1 }
  0xbf   : > { %v511_v52 = vadd.f32 %v510_v51, %v482_v48 }
  0xc0   : > { %v539_v54 = vpop.f32.mrf.mxu2  ;;  %758 = vmatmul.f32.vlgmr.msra.gmra.mxu3 %v701_v50 }
  0xc1   : > { %v540_v55 = vadd.f32 %v539_v54, %v511_v52 }
  0xc2   : > { %v571_v56 = vpop.f32.mrf.mxu3 }
  0xc3   : > { %v569_v57 = vadd.f32 %v568_v41, %v540_v55 }
  0xc5   : > { %v484_v58 = vpop.f32.mrf.mxu0  ;;  %v695_v59 = vmul.f32 0.02, %v569_v57 }
  0xc6   : > { %v485_v60 = vadd.f32 %v484_v58, %v444_v29  ;;  %v821_v58 = vld [vmem:[%s2098_s3 + $0x68] sm:$0xff] }
  0xc7   : > { %v703_v62 = vmax.f32 %v569_v57, %v695_v59  ;;  %v822_v57 = vld [vmem:[%s2098_s3 + $0x70] sm:$0xff]  ;;  %v820_v59 = vld [vmem:[%s2098_s3 + $0x60] sm:$0xff] }
  0xc8   : > { %v513_v63 = vpop.f32.mrf.mxu1  ;;  %v542_v2 = vpop.f32.mrf.mxu2  ;;  %826 = vmatpush.msra.mxu1 %v822_v57 }
  0xc9   : > { %v514_v0 = vadd.f32 %v513_v63, %v485_v60  ;;  %761 = vmatmul.f32.gmra.mxu3 %v703_v62  ;;  %v819_v60 = vld [vmem:[%s2098_s3 + $0x58] sm:$0xff]  ;;  %v818_v62 = vld [vmem:[%s2098_s3 + $0x50] sm:$0xff]  ;;  %v817_v63 = vld [vmem:[%s2098_s3 + $0x48] sm:$0xff] }
  0xca   : > { %827 = vmatpush.msra.mxu1 %v821_v58  ;;  %v919_v58 = vld [vmem:[%s2100_s5 + $0x18] sm:$0xff] }
  0xcb   : > { %v543_v3 = vadd.f32 %v542_v2, %v514_v0  ;;  %v574_v4 = vpop.f32.mrf.mxu3  ;;  %v816_v2 = vld [vmem:[%s2098_s3 + $0x40] sm:$0xff]  ;;  %v815_v0 = vld [vmem:[%s2098_s3 + $0x38] sm:$0xff] }
  0xcc   : > { %828 = vmatpush.msra.mxu1 %v820_v59  ;;  %v918_v59 = vld [vmem:[%s2100_s5 + $0x10] sm:$0xff] }
  0xcd   : > { %v572_v6 = vadd.f32 %v571_v56, %v543_v3  ;;  %v814_v3 = vld [vmem:[%s2098_s3 + $0x30] sm:$0xff] }
  0xce   : > { %v487_v7 = vpop.f32.mrf.mxu0  ;;  %829 = vmatpush.msra.mxu1 %v819_v60 }
  0xcf   : > { %v488_v8 = vadd.f32 %v487_v7, %v444_v29  ;;  %v697_v9 = vmul.f32 0.02, %v572_v6  ;;  %v811_v7 = vld [vmem:[%s2098_s3 + $0x18] sm:$0xff] }
  0xd0   : > { %v516_v10 = vpop.f32.mrf.mxu1  ;;  %830 = vmatpush.msra.mxu1 %v818_v62 }
  0xd1   : > { %v517_v11 = vadd.f32 %v516_v10, %v488_v8  ;;  %v705_v45 = vmax.f32 %v572_v6, %v697_v9  ;;  %v812_v6 = vld [vmem:[%s2098_s3 + $0x20] sm:$0xff]  ;;  %v810_v8 = vld [vmem:[%s2098_s3 + $0x10] sm:$0xff]  ;;  %v809_v9 = vld [vmem:[%s2098_s3 + $0x8] sm:$0xff] }
  0xd2   : > { %v545_v5 = vpop.f32.mrf.mxu2  ;;  %831 = vmatpush.msra.mxu1 %v817_v63  ;;  %v808_v10 = vld [vmem:[%s2098_s3] sm:$0xff]  ;;  %v917_v63 = vld [vmem:[%s2100_s5 + $0x8] sm:$0xff] }
  0xd3   : > { %v546_v61 = vadd.f32 %v545_v5, %v517_v11  ;;  %764 = vmatmul.f32.gmra.mxu3 %v705_v45  ;;  %v741_v45 = vld [vmem:[%s2102_s7 + $0x1] ss:$0 sm:$0xff]  ;;  %v877_v5 = vld [vmem:[%s2099_s4 + $0x78] sm:$0xff] }
  0xd4   : > { %v594_v1 = vpop.f32.mrf.mxu3  ;;  %832 = vmatpush.msra.mxu1 %v816_v2  ;;  %879 = vmatpush.msra.mxu2 %v877_v5  ;;  %v982_v5 = vld [vmem:[%s2101_s6 + $0x38] sm:$0xff] }
  0xd5   : > { %v575_v13 = vadd.f32 %v574_v4, %v546_v61  ;;  %v595_v14 = vadd.f32 %v594_v1, %v445_v12  ;;  %v813_v4 = vld [vmem:[%s2098_s3 + $0x28] sm:$0xff]  ;;  %v876_v61 = vld [vmem:[%s2099_s4 + $0x70] sm:$0xff]  ;;  %1004 = vmatpush.msrb.mxu0 %v982_v5 }
  0xd6   : > { %v623_v15 = vpop.f32.mrf.mxu0  ;;  %833 = vmatpush.msra.mxu1 %v815_v0  ;;  %880 = vmatpush.msra.mxu2 %v876_v61  ;;  %v981_v61 = vld [vmem:[%s2101_s6 + $0x30] sm:$0xff] }
  0xd7   : > { %v624_v16 = vadd.f32 %v623_v15, %v595_v14  ;;  %v699_v17 = vmul.f32 0.02, %v575_v13  ;;  %v875_v15 = vld [vmem:[%s2099_s4 + $0x68] sm:$0xff]  ;;  %1005 = vmatpush.msrb.mxu0 %v981_v61 }
  0xd8   : > { %v652_v18 = vpop.f32.mrf.mxu1  ;;  %834 = vmatpush.msra.mxu1 %v814_v3  ;;  %881 = vmatpush.msra.mxu2 %v875_v15 }
  0xd9   : > { %v653_v19 = vadd.f32 %v652_v18, %v624_v16  ;;  %v707_v20 = vmax.f32 %v575_v13, %v699_v17  ;;  %v874_v17 = vld [vmem:[%s2099_s4 + $0x60] sm:$0xff] }
  0xda   : > { %v681_v22 = vpop.f32.mrf.mxu2  ;;  %835 = vmatpush.msra.mxu1 %v813_v4  ;;  %882 = vmatpush.msra.mxu2 %v874_v17 }
  0xdb   : > { %v682_v23 = vadd.f32 %v681_v22, %v653_v19  ;;  %767 = vmatmul.f32.gmra.mxu3 %v707_v20  ;;  %v873_v19 = vld [vmem:[%s2099_s4 + $0x58] sm:$0xff] }
  0xdc   : > { %v597_v24 = vpop.f32.mrf.mxu3  ;;  %836 = vmatpush.msra.mxu1 %v812_v6  ;;  %883 = vmatpush.msra.mxu2 %v873_v19 }
  0xdd   : > { %v694_v25 = vmul.f32 0.02, %v682_v23  ;;  %v598_v26 = vadd.f32 %v597_v24, %v445_v12  ;;  %v871_v24 = vld [vmem:[%s2099_s4 + $0x48] sm:$0xff] }
  0xde   : > { %v626_v27 = vpop.f32.mrf.mxu0  ;;  %837 = vmatpush.msra.mxu1 %v811_v7  ;;  %884 = vmatpush.msra.mxu2 %v872_v21 }
  0xdf   : > { %v702_v28 = vmax.f32 %v682_v23, %v694_v25  ;;  %v627_v29 = vadd.f32 %v626_v27, %v598_v26  ;;  %v870_v27 = vld [vmem:[%s2099_s4 + $0x40] sm:$0xff] }
  0xe0   : > { %v655_v30 = vpop.f32.mrf.mxu1  ;;  %838 = vmatpush.msra.mxu1 %v810_v8  ;;  %885 = vmatpush.msra.mxu2 %v871_v24 }
  0xe1   : > { %v656_v31 = vadd.f32 %v655_v30, %v627_v29  ;;  %787 = vmatmul.f32.vlgmr.msra.gmra.mxu0 %v702_v28  ;;  %v869_v29 = vld [vmem:[%s2099_s4 + $0x38] sm:$0xff] }
  0xe2   : > { %v684_v32 = vpop.f32.mrf.mxu2  ;;  %839 = vmatpush.msra.mxu1 %v809_v9  ;;  %886 = vmatpush.msra.mxu2 %v870_v27 }
  0xe3   : > { %v685_v33 = vadd.f32 %v684_v32, %v656_v31  ;;  %v868_v31 = vld [vmem:[%s2099_s4 + $0x30] sm:$0xff] }
  0xe4   : > { %v600_v34 = vpop.f32.mrf.mxu3  ;;  %840 = vmatpush.msra.mxu1 %v808_v10  ;;  %887 = vmatpush.msra.mxu2 %v869_v29 }
  0xe5   : > { %v696_v35 = vmul.f32 0.02, %v685_v33  ;;  %v601_v36 = vadd.f32 %v600_v34, %v445_v12  ;;  %v867_v34 = vld [vmem:[%s2099_s4 + $0x28] sm:$0xff] }
  0xe6   : > { %v629_v37 = vpop.f32.mrf.mxu0  ;;  %888 = vmatpush.msra.mxu2 %v868_v31  ;;  %1138 = vmatpush.msrb.mxu1 %v982_v5  ;;  %v977_v31 = vld [vmem:[%s2101_s6 + $0x10] sm:$0xff] }
  0xe7   : > { %v630_v38 = vadd.f32 %v629_v37, %v601_v36  ;;  %v704_v39 = vmax.f32 %v685_v33, %v696_v35  ;;  %v866_v36 = vld [vmem:[%s2099_s4 + $0x20] sm:$0xff] }
  0xe8   : > { %v658_v40 = vpop.f32.mrf.mxu1  ;;  %889 = vmatpush.msra.mxu2 %v867_v34  ;;  %1139 = vmatpush.msrb.mxu1 %v981_v61  ;;  %v924_v34 = vld [vmem:[%s2102_s7 + $0x4] ss:$0 sm:$0xff] }
  0xe9   : > { %v659_v41 = vadd.f32 %v658_v40, %v630_v38  ;;  %790 = vmatmul.f32.gmra.mxu0 %v704_v39  ;;  %v865_v39 = vld [vmem:[%s2099_s4 + $0x18] sm:$0xff] }
  0xea   : > { %v687_v42 = vpop.f32.mrf.mxu2  ;;  %890 = vmatpush.msra.mxu2 %v866_v36 }
  0xeb   : > { %v688_v43 = vadd.f32 %v687_v42, %v659_v41 }
  0xec   : > { %v603_v44 = vpop.f32.mrf.mxu3  ;;  %891 = vmatpush.msra.mxu2 %v865_v39 }
  0xed   : > { %v698_v46 = vmul.f32 0.02, %v688_v43  ;;  %v604_v47 = vadd.f32 %v603_v44, %v445_v12 }
  0xee   : > { %v632_v48 = vpop.f32.mrf.mxu0 }
  0xef   : > { %v633_v49 = vadd.f32 %v632_v48, %v604_v47  ;;  %v706_v50 = vmax.f32 %v688_v43, %v698_v46  ;;  %v864_v46 = vld [vmem:[%s2099_s4 + $0x10] sm:$0xff]  ;;  %v863_v47 = vld [vmem:[%s2099_s4 + $0x8] sm:$0xff]  ;;  %v862_v48 = vld [vmem:[%s2099_s4] sm:$0xff] }
  0xf0   : > { %v661_v51 = vpop.f32.mrf.mxu1  ;;  %892 = vmatpush.msra.mxu2 %v864_v46 }
  0xf1   : > { %v662_v52 = vadd.f32 %v661_v51, %v633_v49  ;;  %793 = vmatmul.f32.gmra.mxu0 %v706_v50  ;;  %v824_v49 = vld [vmem:[%s2102_s7 + $0x2] ss:$0 sm:$0xff]  ;;  %v923_v50 = vld [vmem:[%s2100_s5 + $0x38] sm:$0xff]  ;;  %v922_v51 = vld [vmem:[%s2100_s5 + $0x30] sm:$0xff] }
  0xf2   : > { %v690_v53 = vpop.f32.mrf.mxu2  ;;  %893 = vmatpush.msra.mxu2 %v863_v47  ;;  %946 = vmatpush.msrb.mxu3 %v923_v50 }
  0xf3   : > { %v691_v54 = vadd.f32 %v690_v53, %v662_v52 }
  0xf4   : > { %894 = vmatpush.msra.mxu2 %v862_v48  ;;  %947 = vmatpush.msrb.mxu3 %v922_v51 }
  0xf5   : > { %v700_v55 = vmul.f32 0.02, %v691_v54 }
  0xf7   : > { %v708_v56 = vmax.f32 %v691_v54, %v700_v55  ;;  %v921_v54 = vld [vmem:[%s2100_s5 + $0x28] sm:$0xff] }
  0xf8   : > { %948 = vmatpush.msrb.mxu3 %v921_v54 }
  0xf9   : > { %796 = vmatmul.f32.gmra.mxu0 %v708_v56  ;;  %v920_v56 = vld [vmem:[%s2100_s5 + $0x20] sm:$0xff] }
  0xfa   : > { %949 = vmatpush.msrb.mxu3 %v920_v56 }
  0xfc   : > { %950 = vmatpush.msrb.mxu3 %v919_v58 }
  0xfe   : > { %951 = vmatpush.msrb.mxu3 %v918_v59 }
 0x100   : > { %952 = vmatpush.msrb.mxu3 %v917_v63 }
 0x143   : > { %v759_v11 = vpop.f32.mrf.mxu3 }
 0x144   : > { %v760_v12 = vadd.f32 %v759_v11, %v741_v45 }
 0x14c   : > { %v762_v1 = vpop.f32.mrf.mxu3 }
 0x14d   : > { %v763_v20 = vadd.f32 %v762_v1, %v741_v45 }
 0x156   : > { %v765_v25 = vpop.f32.mrf.mxu3 }
 0x157   : > { %v766_v30 = vadd.f32 %v765_v25, %v741_v45 }
 0x15e   : > { %v788_v13 = vpop.f32.mrf.mxu0  ;;  %v768_v37 = vpop.f32.mrf.mxu3 }
 0x15f   : > { %v789_v14 = vadd.f32 %v788_v13, %v760_v12  ;;  %v769_v40 = vadd.f32 %v768_v37, %v741_v45  ;;  %v916_v45 = vld [vmem:[%s2100_s5] sm:$0xff] }
 0x160   : > { %953 = vmatpush.msrb.mxu3 %v916_v45  ;;  %v878_v12 = vld [vmem:[%s2102_s7 + $0x3] ss:$0 sm:$0xff] }
 0x161   : > { %v800_v16 = vmul.f32 0.02, %v789_v14 }
 0x163   : > { %v804_v18 = vmax.f32 %v789_v14, %v800_v16  ;;  %v980_v14 = vld [vmem:[%s2101_s6 + $0x28] sm:$0xff]  ;;  %v979_v16 = vld [vmem:[%s2101_s6 + $0x20] sm:$0xff] }
 0x164   : > { %1006 = vmatpush.msrb.mxu0 %v980_v14  ;;  %1140 = vmatpush.msrb.mxu1 %v980_v14 }
 0x165   : > { %841 = vmatmul.f32.vlgmr.msra.gmra.mxu1 %v804_v18 }
 0x166   : > { %v791_v22 = vpop.f32.mrf.mxu0  ;;  %1007 = vmatpush.msrb.mxu0 %v979_v16  ;;  %1141 = vmatpush.msrb.mxu1 %v979_v16 }
 0x167   : > { %v792_v23 = vadd.f32 %v791_v22, %v763_v20 }
 0x169   : > { %v801_v26 = vmul.f32 0.02, %v792_v23 }
 0x16b   : > { %v805_v28 = vmax.f32 %v792_v23, %v801_v26 }
 0x16d   : > { %844 = vmatmul.f32.gmra.mxu1 %v805_v28 }
 0x16e   : > { %v794_v32 = vpop.f32.mrf.mxu0 }
 0x16f   : > { %v795_v33 = vadd.f32 %v794_v32, %v766_v30  ;;  %v978_v30 = vld [vmem:[%s2101_s6 + $0x18] sm:$0xff]  ;;  %v976_v32 = vld [vmem:[%s2101_s6 + $0x8] sm:$0xff] }
 0x170   : > { %1008 = vmatpush.msrb.mxu0 %v978_v30  ;;  %1142 = vmatpush.msrb.mxu1 %v978_v30 }
 0x171   : > { %v802_v35 = vmul.f32 0.02, %v795_v33 }
 0x172   : > { %1009 = vmatpush.msrb.mxu0 %v977_v31  ;;  %1143 = vmatpush.msrb.mxu1 %v977_v31 }
 0x173   : > { %v806_v38 = vmax.f32 %v795_v33, %v802_v35  ;;  %v975_v33 = vld [vmem:[%s2101_s6] sm:$0xff] }
 0x174   : > { %1010 = vmatpush.msrb.mxu0 %v976_v32  ;;  %1144 = vmatpush.msrb.mxu1 %v976_v32 }
 0x175   : > { %847 = vmatmul.f32.gmra.mxu1 %v806_v38 }
 0x176   : > { %v797_v41 = vpop.f32.mrf.mxu0  ;;  %1011 = vmatpush.msrb.mxu0 %v975_v33  ;;  %1145 = vmatpush.msrb.mxu1 %v975_v33 }
 0x177   : > { %v798_v42 = vadd.f32 %v797_v41, %v769_v40 }
 0x179   : > { %v803_v43 = vmul.f32 0.02, %v798_v42 }
 0x17b   : > { %v807_v44 = vmax.f32 %v798_v42, %v803_v43 }
 0x17d   : > { %850 = vmatmul.f32.gmra.mxu1 %v807_v44 }
 0x1e2   : > { %v842_v52 = vpop.f32.mrf.mxu1 }
 0x1e3   : > { %v843_v53 = vadd.f32 %v842_v52, %v824_v49  ;;  %v983_v52 = vld [vmem:[%s2102_s7 + $0x5] ss:$0 sm:$0xff] }
 0x1e5   : > { %v854_v55 = vmul.f32 0.02, %v843_v53 }
 0x1e7   : > { %v858_v57 = vmax.f32 %v843_v53, %v854_v55 }
 0x1e9   : > { %895 = vmatmul.f32.vlgmr.msra.gmra.mxu2 %v858_v57 }
 0x1ea   : > { %v845_v60 = vpop.f32.mrf.mxu1 }
 0x1eb   : > { %v846_v62 = vadd.f32 %v845_v60, %v824_v49 }
 0x1ed   : > { %v855_v2 = vmul.f32 0.02, %v846_v62 }
 0x1ef   : > { %v859_v0 = vmax.f32 %v846_v62, %v855_v2 }
 0x1f1   : > { %898 = vmatmul.f32.gmra.mxu2 %v859_v0 }
 0x1f2   : > { %v848_v3 = vpop.f32.mrf.mxu1 }
 0x1f3   : > { %v849_v4 = vadd.f32 %v848_v3, %v824_v49 }
 0x1f5   : > { %v856_v6 = vmul.f32 0.02, %v849_v4 }
 0x1f7   : > { %v860_v7 = vmax.f32 %v849_v4, %v856_v6 }
 0x1f9   : > { %901 = vmatmul.f32.gmra.mxu2 %v860_v7 }
 0x1fa   : > { %v851_v8 = vpop.f32.mrf.mxu1 }
 0x1fb   : > { %v852_v9 = vadd.f32 %v851_v8, %v824_v49 }
 0x1fd   : > { %v857_v10 = vmul.f32 0.02, %v852_v9 }
 0x1ff   : > { %v861_v11 = vmax.f32 %v852_v9, %v857_v10 }
 0x201   : > { %904 = vmatmul.f32.gmra.mxu2 %v861_v11 }
 0x26c   : > { %v896_v1 = vpop.f32.mrf.mxu2 }
 0x26d   : > { %v897_v13 = vadd.f32 %v896_v1, %v878_v12 }
 0x26f   : > { %v908_v15 = vmul.f32 0.02, %v897_v13 }
 0x271   : > { %v912_v17 = vmax.f32 %v897_v13, %v908_v15 }
 0x273   : > { %1123 = vmatmul.msk.f32.vlgmr.msrb.gmra.mxu3 %vm925_vm1, %v912_v17 }
 0x274   : > { %v899_v18 = vpop.f32.mrf.mxu2 }
 0x275   : > { %v900_v19 = vadd.f32 %v899_v18, %v878_v12 }
 0x277   : > { %v909_v20 = vmul.f32 0.02, %v900_v19 }
 0x279   : > { %v913_v21 = vmax.f32 %v900_v19, %v909_v20 }
 0x27b   : > { %1124 = vmatmul.msk.f32.gmra.mxu3 %vm925_vm1, %v913_v21 }
 0x27c   : > { %v902_v22 = vpop.f32.mrf.mxu2 }
 0x27d   : > { %v903_v23 = vadd.f32 %v902_v22, %v878_v12 }
 0x27f   : > { %v910_v24 = vmul.f32 0.02, %v903_v23 }
 0x281   : > { %v914_v25 = vmax.f32 %v903_v23, %v910_v24 }
 0x283   : > { %1125 = vmatmul.msk.f32.gmra.mxu3 %vm925_vm1, %v914_v25 }
 0x284   : > { %v905_v26 = vpop.f32.mrf.mxu2 }
 0x285   : > { %v906_v27 = vadd.f32 %v905_v26, %v878_v12 }
 0x287   : > { %v911_v28 = vmul.f32 0.02, %v906_v27 }
 0x289   : > { %v915_v29 = vmax.f32 %v906_v27, %v911_v28 }
 0x28b   : > { %1126 = vmatmul.msk.f32.gmra.mxu3 %vm925_vm1, %v915_v29 }
 0x2f6   : > { %v955_v35 = vpop.f32.mrf.mxu3 }
 0x2f7   : > { %v956_v36 = vadd.f32 %v955_v35, %v924_v34 }
 0x2f9   : > { %v967_v37 = vmul.f32 0.02, %v956_v36 }
 0x2fb   : > { %v971_v38 = vmax.f32 %v956_v36, %v967_v37 }
 0x2fd   : > { %1127 = vmatmul.msk.f32.vlgmr.msrb.gmra.mxu0 %vm925_vm1, %v971_v38 }
 0x2fe   : > { %v958_v39 = vpop.f32.mrf.mxu3 }
 0x2ff   : > { %v959_v40 = vadd.f32 %v958_v39, %v924_v34 }
 0x301   : > { %v968_v41 = vmul.f32 0.02, %v959_v40 }
 0x303   : > { %v972_v42 = vmax.f32 %v959_v40, %v968_v41 }
 0x305   : > { %1128 = vmatmul.msk.f32.gmra.mxu0 %vm925_vm1, %v972_v42 }
 0x306   : > { %v961_v43 = vpop.f32.mrf.mxu3 }
 0x307   : > { %v962_v44 = vadd.f32 %v961_v43, %v924_v34 }
 0x309   : > { %v969_v46 = vmul.f32 0.02, %v962_v44 }
 0x30b   : > { %v973_v47 = vmax.f32 %v962_v44, %v969_v46 }
 0x30d   : > { %1129 = vmatmul.msk.f32.vlgmr.msrb.gmra.mxu1 %vm925_vm1, %v973_v47 }
 0x30e   : > { %v964_v48 = vpop.f32.mrf.mxu3 }
 0x30f   : > { %v965_v49 = vadd.f32 %v964_v48, %v924_v34 }
 0x311   : > { %v970_v50 = vmul.f32 0.02, %v965_v49 }
 0x313   : > { %v974_v51 = vmax.f32 %v965_v49, %v970_v50 }
 0x315   : > { %1130 = vmatmul.msk.f32.gmra.mxu1 %vm925_vm1, %v974_v51 }
 0x37a   : > { %v1013_v53 = vpop.f32.mrf.mxu0 }
 0x37b   : > { %v1014_v54 = vadd.f32 %v1013_v53, %v983_v52 }
 0x37d   : > { %1025 = vst.msk [vmem:[%s301_s10] sm:$0xff] %vm925_vm1, %v1014_v54 }
 0x382   : > { %v1016_v55 = vpop.f32.mrf.mxu0 }
 0x383   : > { %v1017_v56 = vadd.f32 %v1016_v55, %v983_v52 }
 0x385   : > { %1026 = vst.msk [vmem:[%s301_s10 + $0x8] sm:$0xff] %vm925_vm1, %v1017_v56 }
 0x38a   : > { %v1019_v57 = vpop.f32.mrf.mxu1 }
 0x38b   : > { %v1020_v58 = vadd.f32 %v1019_v57, %v983_v52 }
 0x38d   : > { %1027 = vst.msk [vmem:[%s301_s10 + $0x10] sm:$0xff] %vm925_vm1, %v1020_v58 }
 0x392   : > { %v1022_v59 = vpop.f32.mrf.mxu1 }
 0x393   : > { %v1023_v60 = vadd.f32 %v1022_v59, %v983_v52 }
 0x395   : > { %1028 = vst.msk [vmem:[%s301_s10 + $0x18] sm:$0xff] %vm925_vm1, %v1023_v60 }
 0x396   : > { %1214 = shalt.err (!%p1211_p3)
}
 0x397   : > { %s1251_s25 = smov 128   ;;  %s1252_s10 = smov 8  }
 0x398   : > { %1146 = dma.vmem_to_hbm [thread:$0]  (%p1336_p5), %s1043_s22, 512, %s1045_s23, %s1030_s24, %s1251_s25, %s1251_s25, %s1252_s10  }
 0x399 PF: > { %p1152_p4 = scmp.ge.s32.totalorder %s1249_s30, 2  ;;  %s1059_s20 = sand.u32 1, %s1237_s27  }
 0x39a   : > { %s1060_s21 = scalar_lea.sflag [#allocation3], %s1059_s20 }
 0x39b   : > { %p1149_p7 = pnand %p1152_p4, %p1340_p6 }
 0x39d   : > { %p1150_p8 = pneg %p1149_p7 }
 0x39f   : > { %1232 = dma.done.wait (%p1150_p8), %s1060_s21, 512  }
 0x3a0   : > { %1234 = vsyncadd (%p1150_p8), %s1060_s21, 4294966784  ;;  %p18_p9 = scmp.ge.s32.totalorder %s1323_s11, 4   ;;  %s2107_s27 = smov %s1241_s28 }
 0x3a1   : > { %s2108_s28 = smov %s1245_s29  ;;  %s2109_s29 = smov %s1334_s14 }
 0x3a2   : > { %s2110_s30 = smov %s1323_s11  ;;  %20 = sbr.rel (!%p18_p9) target bundleno = 3 (0x3), region = 87 }
 0x3a7   :  { %1066 = vsyncpa [#allocation3], 1 }
 0x3a8   :  { %1068 = vsyncpa [#allocation3 + $0x1], 1 }

</bundles_post_ra>
